<compile_context>
chip_gen: v7x
topology: tpu7x:2x2x1
jax: 0.10.0
libtpu: 0.0.40
codegen_flags: <defaults>
</compile_context>

<pallas_src>
import functools

import jax
import jax.numpy as jnp
from jax.experimental import pallas as pl
from jax.experimental.pallas import tpu as pltpu

BN_EPS = 1e-5


def _round_up(x, m):
    return ((x + m - 1) // m) * m


def _vmem_limit_bytes():
    # ~75% of physical VMEM, capped at 96 MiB: ~48 MiB on v7x (64 MiB phys),
    # 96 MiB on v5e/v6e (128 MiB phys). Fallback is safe on every generation.
    try:
        cap = pltpu.get_tpu_info().vmem_capacity_bytes
    except Exception:
        cap = 64 * 1024 * 1024
    return int(min(cap * 3 // 4, 96 * 1024 * 1024))


# ------------------------------------------------------------ fused kernel --
def _critic_fused_kernel(state_ref, action_ref, w1_ref, b1_ref,
                         w2q_ref, w2a_ref, b2_ref, w3t_ref, b3_ref,
                         out_ref,
                         h1_ref, sum_ref, sumsq_ref, scale_ref, shift_ref,
                         *, batch, bt, n_tiles, pad_start_tile, has_pad,
                         compute_dtype):
    p = pl.program_id(0)      # phase: 0 = l1 + BN stats, 1 = BN apply + l2 + l3
    i = pl.program_id(1)      # batch tile
    row0 = pl.multiple_of(i * bt, 8)

    # ---------------- phase 0: h1 = tanh(l1(state)); batch statistics -------
    @pl.when(p == 0)
    def _stats_phase():
        @pl.when(i == 0)
        def _init():
            sum_ref[...] = jnp.zeros_like(sum_ref)
            sumsq_ref[...] = jnp.zeros_like(sumsq_ref)

        h1 = jnp.tanh(
            jnp.dot(state_ref[...], w1_ref[...],
                    preferred_element_type=jnp.float32)
            + b1_ref[...])                                       # (bt, H) f32

        # Cache h1 for phase 1: avoids re-streaming `state` and re-running the
        # l1 matmul + tanh (tanh/EUP is the likely binding unit at steady state).
        h1_ref[pl.ds(row0, bt), :] = h1.astype(h1_ref.dtype)

        def _accum(x):
            sum_ref[...] = sum_ref[...] + jnp.sum(x, axis=0, keepdims=True)
            sumsq_ref[...] = sumsq_ref[...] + jnp.sum(x * x, axis=0,
                                                      keepdims=True)

        if has_pad:  # static: masking only emitted when the batch was padded
            @pl.when(i < pad_start_tile)
            def _full():
                _accum(h1)

            @pl.when(i >= pad_start_tile)
            def _masked():
                r = jax.lax.broadcasted_iota(jnp.int32, h1.shape, 0) + i * bt
                _accum(jnp.where(r < batch, h1, 0.0))
        else:
            _accum(h1)

        # Finalize folded BN (gamma=1, beta=0) scale/shift once per kernel.
        @pl.when(i == n_tiles - 1)
        def _finalize():
            mean = sum_ref[...] * (1.0 / batch)
            # var = E[x^2] - mean^2 (safe enough here: h1 = tanh(...) in [-1,1]).
            var = jnp.maximum(sumsq_ref[...] * (1.0 / batch) - mean * mean, 0.0)
            inv_std = jax.lax.rsqrt(var + BN_EPS)
            scale_ref[...] = inv_std
            shift_ref[...] = -mean * inv_std

    # ---------------- phase 1: BN apply + l2 + l3 ----------------------------
    @pl.when(p == 1)
    def _fwd_phase():
        h1 = h1_ref[pl.ds(row0, bt), :].astype(jnp.float32)
        q = h1 * scale_ref[...] + shift_ref[...]
        # l2 on concat([q, action]) as a split matmul + tanh.
        h2 = jnp.tanh(
            jnp.dot(q.astype(compute_dtype), w2q_ref[...],
                    preferred_element_type=jnp.float32)
            + jnp.dot(action_ref[...], w2a_ref[...],
                      preferred_element_type=jnp.float32)
            + b2_ref[...])                                       # (bt, H) f32
        # l3 computed transposed so the output is lane-dense: (8,H) x (bt,H)^T.
        out_t = jax.lax.dot_general(
            w3t_ref[...], h2.astype(compute_dtype),
            dimension_numbers=(((1,), (1,)), ((), ())),
            preferred_element_type=jnp.float32)                  # (8, bt)
        out_ref[...] = out_t[0:1, :] + b3_ref[0, 0]


# ------------------------------------------------- two-pass fallback kernels -
def _bn_stats_kernel(state_ref, w1_ref, b1_ref, sum_ref, sumsq_ref, *,
                     batch, bt, pad_start_tile, has_pad):
    """Accumulate per-feature sum(h1) and sum(h1^2), h1 = tanh(l1(state))."""
    i = pl.program_id(0)

    @pl.when(i == 0)
    def _init():
        sum_ref[...] = jnp.zeros_like(sum_ref)
        sumsq_ref[...] = jnp.zeros_like(sumsq_ref)

    h1 = jnp.tanh(
        jnp.dot(state_ref[...], w1_ref[...],
                preferred_element_type=jnp.float32)
        + b1_ref[...])                                           # (bt, H) f32

    def _accum(x):
        sum_ref[...] = sum_ref[...] + jnp.sum(x, axis=0, keepdims=True)
        sumsq_ref[...] = sumsq_ref[...] + jnp.sum(x * x, axis=0, keepdims=True)

    if has_pad:
        @pl.when(i < pad_start_tile)
        def _full():
            _accum(h1)

        @pl.when(i >= pad_start_tile)
        def _masked():
            r = jax.lax.broadcasted_iota(jnp.int32, h1.shape, 0) + i * bt
            _accum(jnp.where(r < batch, h1, 0.0))
    else:
        _accum(h1)


def _critic_fwd_kernel(state_ref, action_ref, w1_ref, b1_ref,
                       w2qf_ref, w2a_ref, b2f_ref, w3t_ref, b3_ref,
                       out_ref, *, compute_dtype):
    """BN already folded into (w2qf, b2f) on the host; recompute l1 per tile."""
    h1 = jnp.tanh(
        jnp.dot(state_ref[...], w1_ref[...],
                preferred_element_type=jnp.float32)
        + b1_ref[...])                                           # (bt, H) f32
    h2 = jnp.tanh(
        jnp.dot(h1.astype(compute_dtype), w2qf_ref[...],
                preferred_element_type=jnp.float32)
        + jnp.dot(action_ref[...], w2a_ref[...],
                  preferred_element_type=jnp.float32)
        + b2f_ref[...])                                          # (bt, H) f32
    out_t = jax.lax.dot_general(
        w3t_ref[...], h2.astype(compute_dtype),
        dimension_numbers=(((1,), (1,)), ((), ())),
        preferred_element_type=jnp.float32)                      # (8, bt)
    out_ref[...] = out_t[0:1, :] + b3_ref[0, 0]


# ------------------------------------------------------------------ wrapper -
@functools.partial(jax.jit, static_argnames=("block_batch", "compute_dtype",
                                             "force_two_pass"))
def critic_forward(state, action, params, *, block_batch=8192,
                   compute_dtype=jnp.bfloat16, force_two_pass=False):
    """Critic forward pass.

    state : (B, state_dim) float32
    action: (B, action_dim) float32
    returns (B, 1) float32
    """
    assert block_batch % 128 == 0
    B, S = state.shape
    A = action.shape[1]
    H = params["w1"].shape[1]
    cdt = jnp.dtype(compute_dtype)
    vmem_limit = _vmem_limit_bytes()

    # ---- batch tiling -------------------------------------------------------
    # Align the padded batch to 128 (lane-dense output) when possible, and
    # distribute rows evenly across tiles so padding stays small.
    b_align = 128 if B > 128 else 8
    n_tiles = int(pl.cdiv(_round_up(max(B, 1), b_align), block_batch))
    bt = _round_up(int(pl.cdiv(B, n_tiles)), b_align)
    b_pad = bt * n_tiles
    has_pad = b_pad != B
    pad_start_tile = B // bt             # first tile that may contain padding
    if has_pad:
        state = jnp.pad(state, ((0, b_pad - B), (0, 0)))
        action = jnp.pad(action, ((0, b_pad - B), (0, 0)))
    # TODO(synk): for very large B the pad+cast below is itself an HBM pass;
    # in-kernel ragged-tail masking / allow_input_fusion would remove it.

    # Compute-dtype casts (bf16 halves streamed DMA bytes; f32 accumulation).
    state_c = state.astype(cdt)
    action_c = action.astype(cdt)
    w1 = params["w1"].astype(cdt)
    b1 = params["b1"].astype(jnp.float32)
    w2q_f32 = params["w2q"]
    w2a = params["w2a"].astype(cdt)
    b2 = params["b2"].astype(jnp.float32)
    # Final weight, transposed and padded to 8 sublanes (row 0 is real).
    w3t = jnp.pad(params["w3"].astype(cdt).T, ((0, 7), (0, 0)))   # (8, H)
    b3 = params["b3"].astype(jnp.float32).reshape(1, 1)

    # Fuse both passes when the whole-batch h1 cache fits comfortably in VMEM.
    h1_cache_bytes = b_pad * H * cdt.itemsize
    fuse = (not force_two_pass) and (h1_cache_bytes <= vmem_limit // 2)

    if fuse:
        w2q_c = w2q_f32.astype(cdt)

        def resident(x):
            # Constant index map -> VMEM-resident weights/biases across the grid.
            # (pipeline_mode=pl.Buffered(1) would single-buffer these and halve
            #  their VMEM footprint; left at default for portability.)
            return pl.BlockSpec(x.shape, lambda p, i: (0, 0))

        kern = functools.partial(
            _critic_fused_kernel, batch=B, bt=bt, n_tiles=n_tiles,
            pad_start_tile=pad_start_tile, has_pad=has_pad, compute_dtype=cdt)

        out_t = pl.pallas_call(
            kern,
            grid=(2, n_tiles),
            in_specs=[
                # state streams in phase 0, pins block 0 in phase 1 (unused).
                pl.BlockSpec((bt, S), lambda p, i: (i * (1 - p), 0)),
                # action pins block 0 in phase 0, streams in phase 1.
                pl.BlockSpec((bt, A), lambda p, i: (i * p, 0)),
                resident(w1), resident(b1),
                resident(w2q_c), resident(w2a), resident(b2),
                resident(w3t),
                pl.BlockSpec(memory_space=pltpu.MemorySpace.SMEM),  # b3 scalar
            ],
            # Lane-dense output; pinned to block 0 during phase 0 (never
            # flushed there), written and streamed out during phase 1.
            out_specs=pl.BlockSpec((1, bt), lambda p, i: (0, i * p)),
            out_shape=jax.ShapeDtypeStruct((1, b_pad), jnp.float32),
            scratch_shapes=[
                pltpu.VMEM((b_pad, H), cdt),        # h1 cache (whole batch)
                pltpu.VMEM((1, H), jnp.float32),    # sum(h1)
                pltpu.VMEM((1, H), jnp.float32),    # sum(h1^2)
                pltpu.VMEM((1, H), jnp.float32),    # folded BN scale
                pltpu.VMEM((1, H), jnp.float32),    # folded BN shift
            ],
            compiler_params=pltpu.CompilerParams(
                dimension_semantics=("arbitrary", "arbitrary"),
                vmem_limit_bytes=vmem_limit),
        )(state_c, action_c, w1, b1, w2q_c, w2a, b2, w3t, b3)
        return out_t[0, :B].reshape(B, 1)

    # -------------------- two-pass streaming fallback (very large batches) ---
    s1, s2 = pl.pallas_call(
        functools.partial(_bn_stats_kernel, batch=B, bt=bt,
                          pad_start_tile=pad_start_tile, has_pad=has_pad),
        grid=(n_tiles,),
        in_specs=[
            pl.BlockSpec((bt, S), lambda i: (i, 0)),
            pl.BlockSpec(w1.shape, lambda i: (0, 0)),
            pl.BlockSpec(b1.shape, lambda i: (0, 0)),
        ],
        out_specs=(pl.BlockSpec((1, H), lambda i: (0, 0)),
                   pl.BlockSpec((1, H), lambda i: (0, 0))),
        out_shape=(jax.ShapeDtypeStruct((1, H), jnp.float32),
                   jax.ShapeDtypeStruct((1, H), jnp.float32)),
        compiler_params=pltpu.CompilerParams(
            dimension_semantics=("arbitrary",),
            vmem_limit_bytes=vmem_limit),
    )(state_c, w1, b1)
    # TODO(synk): on v7x (2 TCs) add a leading size-2 "parallel" axis producing
    # per-core partial sums to use both cores for this stats pass.

    # Host glue: fold BN (gamma=1, beta=0) into l2's weight/bias.
    mean = s1 / B
    var = jnp.maximum(s2 / B - mean * mean, 0.0)
    inv_std = jax.lax.rsqrt(var + BN_EPS)
    w2qf = (inv_std.reshape(H, 1) * w2q_f32).astype(cdt)
    b2f = b2 + (-mean * inv_std) @ w2q_f32

    def resident1(x):
        return pl.BlockSpec(x.shape, lambda i: (0, 0))

    out_t = pl.pallas_call(
        functools.partial(_critic_fwd_kernel, compute_dtype=cdt),
        grid=(n_tiles,),
        in_specs=[
            pl.BlockSpec((bt, S), lambda i: (i, 0)),
            pl.BlockSpec((bt, A), lambda i: (i, 0)),
            resident1(w1), resident1(b1),
            resident1(w2qf), resident1(w2a), resident1(b2f),
            resident1(w3t),
            pl.BlockSpec(memory_space=pltpu.MemorySpace.SMEM),    # b3 scalar
        ],
        out_specs=pl.BlockSpec((1, bt), lambda i: (0, i)),        # lane-dense
        out_shape=jax.ShapeDtypeStruct((1, b_pad), jnp.float32),
        compiler_params=pltpu.CompilerParams(
            dimension_semantics=("parallel",),
            vmem_limit_bytes=vmem_limit),
    )(state_c, action_c, w1, b1, w2qf, w2a, b2f, w3t, b3)
    return out_t[0, :B].reshape(B, 1)


# ---------------------------------------------------------------- params ----
def init_critic_params(key, state_dim, action_dim):
    """Deterministic synthetic parameters matching the PyTorch module shapes."""
    if state_dim + action_dim == 0:
        hidden_dim = 1
    else:
        hidden_dim = 1 << (state_dim + action_dim - 1).bit_length()

    ks = jax.random.split(key, 6)
    # Weights stored as (in, out); biases as (1, out) for in-kernel broadcast.
    w1 = jax.random.normal(ks[0], (state_dim, hidden_dim), jnp.float32) * 0.1
    b1 = jax.random.normal(ks[1], (1, hidden_dim), jnp.float32) * 0.1
    # l2 takes concat([q, action]) -> split its weight into q and action parts.
    w2 = jax.random.normal(ks[2], (hidden_dim + action_dim, hidden_dim),
                           jnp.float32) * 0.1
    b2 = jax.random.normal(ks[3], (1, hidden_dim), jnp.float32) * 0.1
    w3 = jax.random.normal(ks[4], (hidden_dim, 1), jnp.float32) * 0.1
    b3 = jax.random.normal(ks[5], (1, 1), jnp.float32) * 0.1

    return {
        "w1": w1, "b1": b1,
        "w2q": w2[:hidden_dim], "w2a": w2[hidden_dim:], "b2": b2,
        "w3": w3, "b3": b3,
    }


def critic_reference(state, action, params):
    """Pure-JAX f32 reference for correctness checking."""
    h1 = jnp.tanh(state @ params["w1"] + params["b1"])
    mean = jnp.mean(h1, axis=0, keepdims=True)
    var = jnp.mean((h1 - mean) ** 2, axis=0, keepdims=True)
    q = (h1 - mean) * jax.lax.rsqrt(var + BN_EPS)
    h2 = jnp.tanh(q @ params["w2q"] + action @ params["w2a"] + params["b2"])
    return h2 @ params["w3"] + params["b3"]


if __name__ == "__main__":
    key = jax.random.PRNGKey(0)
    k_s, k_a, k_p = jax.random.split(key, 3)

    batch = 8
    state_dim = 12
    action_dim = 4   # hidden_dim = next_pow2(16) = 16

    state = jax.random.normal(k_s, (batch, state_dim), jnp.float32)
    action = jax.random.normal(k_a, (batch, action_dim), jnp.float32)
    params = init_critic_params(k_p, state_dim, action_dim)

    ref = critic_reference(state, action, params)

    # Fused single-call path, f32: tight parity with float32 PyTorch semantics.
    out = jax.block_until_ready(
        critic_forward(state, action, params, compute_dtype=jnp.float32))
    assert out.shape == (batch, 1), out.shape
    assert jnp.allclose(out, ref, atol=1e-4, rtol=1e-4), (out, ref)

    # Default bf16 streaming/MXU path (f32 accumulation).
    out_bf16 = jax.block_until_ready(critic_forward(state, action, params))
    assert out_bf16.shape == (batch, 1), out_bf16.shape
    assert jnp.allclose(out_bf16, ref, atol=1e-1, rtol=1e-1), (out_bf16, ref)

    # Two-pass streaming fallback (used when the h1 cache would not fit VMEM).
    out_tp = jax.block_until_ready(
        critic_forward(state, action, params, compute_dtype=jnp.float32,
                       force_two_pass=True))
    assert jnp.allclose(out_tp, ref, atol=1e-4, rtol=1e-4), (out_tp, ref)

    # Multi-tile + ragged batch: exercises both grid phases, h1-cache slicing
    # and last-tile masking (B=260 with 128-row tiles -> 3 tiles, 124 pad rows).
    b_big = 260
    state2 = jax.random.normal(jax.random.PRNGKey(1), (b_big, state_dim),
                               jnp.float32)
    action2 = jax.random.normal(jax.random.PRNGKey(2), (b_big, action_dim),
                                jnp.float32)
    ref2 = critic_reference(state2, action2, params)
    out2 = jax.block_until_ready(
        critic_forward(state2, action2, params, block_batch=128,
                       compute_dtype=jnp.float32))
    assert out2.shape == (b_big, 1), out2.shape
    assert jnp.allclose(out2, ref2, atol=1e-4, rtol=1e-4), (out2, ref2)

    print("KERNEL_OK")
</pallas_src>

<mosaic_0001>
module attributes {stable_mosaic.version = 11 : i64} {
  func.func @_critic_fused_kernel(%arg0: i32, %arg1: i32, %arg2: memref<8x12xf32, #tpu.memory_space<vmem>>, %arg3: memref<8x4xf32, #tpu.memory_space<vmem>>, %arg4: memref<12x16xf32, #tpu.memory_space<vmem>>, %arg5: memref<1x16xf32, #tpu.memory_space<vmem>>, %arg6: memref<16x16xf32, #tpu.memory_space<vmem>>, %arg7: memref<4x16xf32, #tpu.memory_space<vmem>>, %arg8: memref<1x16xf32, #tpu.memory_space<vmem>>, %arg9: memref<8x16xf32, #tpu.memory_space<vmem>>, %arg10: memref<1x1xf32, #tpu.memory_space<smem>>, %arg11: memref<1x8xf32, #tpu.memory_space<vmem>>, %arg12: memref<8x16xf32, #tpu.memory_space<vmem>>, %arg13: memref<1x16xf32, #tpu.memory_space<vmem>>, %arg14: memref<1x16xf32, #tpu.memory_space<vmem>>, %arg15: memref<1x16xf32, #tpu.memory_space<vmem>>, %arg16: memref<1x16xf32, #tpu.memory_space<vmem>>) attributes {dimension_semantics = [#tpu.dimension_semantics<arbitrary>, #tpu.dimension_semantics<arbitrary>], iteration_bounds = array<i64: 2, 1>, scalar_prefetch = 0 : i64, scratch_operands = 5 : i64, tpu.core_type = #tpu.core_type<tc>, window_params = [{transform_indices = @transform_0, window_bounds = array<i64: 8, 12>}, {transform_indices = @transform_1, window_bounds = array<i64: 8, 4>}, {pipeline_mode = #tpu.pipeline_mode<synchronous>, transform_indices = @transform_2, window_bounds = array<i64: 12, 16>}, {pipeline_mode = #tpu.pipeline_mode<synchronous>, transform_indices = @transform_3, window_bounds = array<i64: 1, 16>}, {pipeline_mode = #tpu.pipeline_mode<synchronous>, transform_indices = @transform_4, window_bounds = array<i64: 16, 16>}, {pipeline_mode = #tpu.pipeline_mode<synchronous>, transform_indices = @transform_5, window_bounds = array<i64: 4, 16>}, {pipeline_mode = #tpu.pipeline_mode<synchronous>, transform_indices = @transform_6, window_bounds = array<i64: 1, 16>}, {pipeline_mode = #tpu.pipeline_mode<synchronous>, transform_indices = @transform_7, window_bounds = array<i64: 8, 16>}, {transform_indices = @transform_8, window_bounds = array<i64: 1, 1>}, {transform_indices = @transform_9, window_bounds = array<i64: 1, 8>}]} {
    %c8_i32 = arith.constant 8 : i32
    %0 = arith.muli %arg1, %c8_i32 : i32
    %1 = tpu.assume_multiple %0, 8 : i32
    %c0_i32 = arith.constant 0 : i32
    %2 = arith.cmpi eq, %arg0, %c0_i32 : i32
    %3 = arith.extui %2 : i1 to i32
    %c0_i32_0 = arith.constant 0 : i32
    %4 = arith.cmpi ne, %3, %c0_i32_0 : i32
    scf.if %4 {
      %c0_i32_2 = arith.constant 0 : i32
      %8 = arith.cmpi eq, %arg1, %c0_i32_2 : i32
      %9 = arith.extui %8 : i1 to i32
      %c0_i32_3 = arith.constant 0 : i32
      %10 = arith.cmpi ne, %9, %c0_i32_3 : i32
      scf.if %10 {
        %cst_22 = arith.constant 0.000000e+00 : f32
        %34 = vector.broadcast %cst_22 : f32 to vector<1x16xf32>
        %c0_23 = arith.constant 0 : index
        %c0_24 = arith.constant 0 : index
        %35 = vector.load %arg13[%c0_23, %c0_24] : memref<1x16xf32, #tpu.memory_space<vmem>>, vector<1x16xf32>
        tpu.vector_store %arg13[%c0_23, %c0_24], %34 {strides = array<i32>} : memref<1x16xf32, #tpu.memory_space<vmem>>, vector<1x16xf32>,
        %cst_25 = arith.constant 0.000000e+00 : f32
        %36 = vector.broadcast %cst_25 : f32 to vector<1x16xf32>
        %c0_26 = arith.constant 0 : index
        %c0_27 = arith.constant 0 : index
        %37 = vector.load %arg14[%c0_26, %c0_27] : memref<1x16xf32, #tpu.memory_space<vmem>>, vector<1x16xf32>
        tpu.vector_store %arg14[%c0_26, %c0_27], %36 {strides = array<i32>} : memref<1x16xf32, #tpu.memory_space<vmem>>, vector<1x16xf32>,
      } else {
      }
      %c0 = arith.constant 0 : index
      %c0_4 = arith.constant 0 : index
      %11 = vector.load %arg2[%c0, %c0_4] : memref<8x12xf32, #tpu.memory_space<vmem>>, vector<8x12xf32>
      %c0_5 = arith.constant 0 : index
      %c0_6 = arith.constant 0 : index
      %12 = vector.load %arg4[%c0_5, %c0_6] : memref<12x16xf32, #tpu.memory_space<vmem>>, vector<12x16xf32>
      %cst = arith.constant dense<0.000000e+00> : vector<8x16xf32>
      %13 = tpu.matmul %11, %12, %cst {dimension_numbers = #tpu.dot_dimension_numbers<[1], [0], [0], [1], [0, 0, 1, 1], [], []>} : vector<8x12xf32>, vector<12x16xf32>, vector<8x16xf32> -> vector<8x16xf32>
      %c0_7 = arith.constant 0 : index
      %c0_8 = arith.constant 0 : index
      %14 = vector.load %arg5[%c0_7, %c0_8] : memref<1x16xf32, #tpu.memory_space<vmem>>, vector<1x16xf32>
      %15 = vector.broadcast %14 : vector<1x16xf32> to vector<8x16xf32>
      %16 = arith.addf %13, %15 : vector<8x16xf32>
      %17 = math.tanh %16 : vector<8x16xf32>
      %18 = arith.index_cast %1 : i32 to index
      %c0_9 = arith.constant 0 : index
      %19 = vector.load %arg12[%18, %c0_9] : memref<8x16xf32, #tpu.memory_space<vmem>>, vector<8x16xf32>
      tpu.vector_store %arg12[%18, %c0_9], %17 {strides = array<i32>} : memref<8x16xf32, #tpu.memory_space<vmem>>, vector<8x16xf32>,
      %c0_10 = arith.constant 0 : index
      %c0_11 = arith.constant 0 : index
      %20 = vector.load %arg13[%c0_10, %c0_11] : memref<1x16xf32, #tpu.memory_space<vmem>>, vector<1x16xf32>
      %cst_12 = arith.constant dense<0.000000e+00> : vector<16xf32>
      %21 = vector.multi_reduction <add>, %17, %cst_12 [0] : vector<8x16xf32> to vector<16xf32>
      %22 = vector.shape_cast %21 : vector<16xf32> to vector<1x16xf32>
      %23 = arith.addf %20, %22 : vector<1x16xf32>
      %c0_13 = arith.constant 0 : index
      %c0_14 = arith.constant 0 : index
      %24 = vector.load %arg13[%c0_13, %c0_14] : memref<1x16xf32, #tpu.memory_space<vmem>>, vector<1x16xf32>
      tpu.vector_store %arg13[%c0_13, %c0_14], %23 {strides = array<i32>} : memref<1x16xf32, #tpu.memory_space<vmem>>, vector<1x16xf32>,
      %c0_15 = arith.constant 0 : index
      %c0_16 = arith.constant 0 : index
      %25 = vector.load %arg14[%c0_15, %c0_16] : memref<1x16xf32, #tpu.memory_space<vmem>>, vector<1x16xf32>
      %26 = arith.mulf %17, %17 : vector<8x16xf32>
      %cst_17 = arith.constant dense<0.000000e+00> : vector<16xf32>
      %27 = vector.multi_reduction <add>, %26, %cst_17 [0] : vector<8x16xf32> to vector<16xf32>
      %28 = vector.shape_cast %27 : vector<16xf32> to vector<1x16xf32>
      %29 = arith.addf %25, %28 : vector<1x16xf32>
      %c0_18 = arith.constant 0 : index
      %c0_19 = arith.constant 0 : index
      %30 = vector.load %arg14[%c0_18, %c0_19] : memref<1x16xf32, #tpu.memory_space<vmem>>, vector<1x16xf32>
      tpu.vector_store %arg14[%c0_18, %c0_19], %29 {strides = array<i32>} : memref<1x16xf32, #tpu.memory_space<vmem>>, vector<1x16xf32>,
      %c0_i32_20 = arith.constant 0 : i32
      %31 = arith.cmpi eq, %arg1, %c0_i32_20 : i32
      %32 = arith.extui %31 : i1 to i32
      %c0_i32_21 = arith.constant 0 : i32
      %33 = arith.cmpi ne, %32, %c0_i32_21 : i32
      scf.if %33 {
        %c0_22 = arith.constant 0 : index
        %c0_23 = arith.constant 0 : index
        %34 = vector.load %arg13[%c0_22, %c0_23] : memref<1x16xf32, #tpu.memory_space<vmem>>, vector<1x16xf32>
        %cst_24 = arith.constant 1.250000e-01 : f32
        %35 = vector.broadcast %cst_24 : f32 to vector<1x16xf32>
        %36 = arith.mulf %34, %35 : vector<1x16xf32>
        %c0_25 = arith.constant 0 : index
        %c0_26 = arith.constant 0 : index
        %37 = vector.load %arg14[%c0_25, %c0_26] : memref<1x16xf32, #tpu.memory_space<vmem>>, vector<1x16xf32>
        %cst_27 = arith.constant 1.250000e-01 : f32
        %38 = vector.broadcast %cst_27 : f32 to vector<1x16xf32>
        %39 = arith.mulf %37, %38 : vector<1x16xf32>
        %40 = arith.mulf %36, %36 : vector<1x16xf32>
        %41 = arith.subf %39, %40 : vector<1x16xf32>
        %cst_28 = arith.constant 0.000000e+00 : f32
        %42 = vector.broadcast %cst_28 : f32 to vector<1x16xf32>
        %43 = arith.maximumf %41, %42 : vector<1x16xf32>
        %cst_29 = arith.constant 9.99999974E-6 : f32
        %44 = vector.broadcast %cst_29 : f32 to vector<1x16xf32>
        %45 = arith.addf %43, %44 : vector<1x16xf32>
        %46 = math.rsqrt %45 : vector<1x16xf32>
        %c0_30 = arith.constant 0 : index
        %c0_31 = arith.constant 0 : index
        %47 = vector.load %arg15[%c0_30, %c0_31] : memref<1x16xf32, #tpu.memory_space<vmem>>, vector<1x16xf32>
        tpu.vector_store %arg15[%c0_30, %c0_31], %46 {strides = array<i32>} : memref<1x16xf32, #tpu.memory_space<vmem>>, vector<1x16xf32>,
        %cst_32 = arith.constant 0.000000e+00 : f32
        %48 = vector.broadcast %cst_32 : f32 to vector<1x16xf32>
        %49 = arith.subf %48, %36 : vector<1x16xf32>
        %50 = arith.mulf %49, %46 : vector<1x16xf32>
        %c0_33 = arith.constant 0 : index
        %c0_34 = arith.constant 0 : index
        %51 = vector.load %arg16[%c0_33, %c0_34] : memref<1x16xf32, #tpu.memory_space<vmem>>, vector<1x16xf32>
        tpu.vector_store %arg16[%c0_33, %c0_34], %50 {strides = array<i32>} : memref<1x16xf32, #tpu.memory_space<vmem>>, vector<1x16xf32>,
      } else {
      }
    } else {
    }
    %c1_i32 = arith.constant 1 : i32
    %5 = arith.cmpi eq, %arg0, %c1_i32 : i32
    %6 = arith.extui %5 : i1 to i32
    %c0_i32_1 = arith.constant 0 : i32
    %7 = arith.cmpi ne, %6, %c0_i32_1 : i32
    scf.if %7 {
      %8 = arith.index_cast %1 : i32 to index
      %c0 = arith.constant 0 : index
      %9 = vector.load %arg12[%8, %c0] : memref<8x16xf32, #tpu.memory_space<vmem>>, vector<8x16xf32>
      %c0_2 = arith.constant 0 : index
      %c0_3 = arith.constant 0 : index
      %10 = vector.load %arg15[%c0_2, %c0_3] : memref<1x16xf32, #tpu.memory_space<vmem>>, vector<1x16xf32>
      %11 = vector.broadcast %10 : vector<1x16xf32> to vector<8x16xf32>
      %12 = arith.mulf %9, %11 : vector<8x16xf32>
      %c0_4 = arith.constant 0 : index
      %c0_5 = arith.constant 0 : index
      %13 = vector.load %arg16[%c0_4, %c0_5] : memref<1x16xf32, #tpu.memory_space<vmem>>, vector<1x16xf32>
      %14 = vector.broadcast %13 : vector<1x16xf32> to vector<8x16xf32>
      %15 = arith.addf %12, %14 : vector<8x16xf32>
      %c0_6 = arith.constant 0 : index
      %c0_7 = arith.constant 0 : index
      %16 = vector.load %arg6[%c0_6, %c0_7] : memref<16x16xf32, #tpu.memory_space<vmem>>, vector<16x16xf32>
      %cst = arith.constant dense<0.000000e+00> : vector<8x16xf32>
      %17 = tpu.matmul %15, %16, %cst {dimension_numbers = #tpu.dot_dimension_numbers<[1], [0], [0], [1], [0, 0, 1, 1], [], []>} : vector<8x16xf32>, vector<16x16xf32>, vector<8x16xf32> -> vector<8x16xf32>
      %c0_8 = arith.constant 0 : index
      %c0_9 = arith.constant 0 : index
      %18 = vector.load %arg3[%c0_8, %c0_9] : memref<8x4xf32, #tpu.memory_space<vmem>>, vector<8x4xf32>
      %c0_10 = arith.constant 0 : index
      %c0_11 = arith.constant 0 : index
      %19 = vector.load %arg7[%c0_10, %c0_11] : memref<4x16xf32, #tpu.memory_space<vmem>>, vector<4x16xf32>
      %cst_12 = arith.constant dense<0.000000e+00> : vector<8x16xf32>
      %20 = tpu.matmul %18, %19, %cst_12 {dimension_numbers = #tpu.dot_dimension_numbers<[1], [0], [0], [1], [0, 0, 1, 1], [], []>} : vector<8x4xf32>, vector<4x16xf32>, vector<8x16xf32> -> vector<8x16xf32>
      %21 = arith.addf %17, %20 : vector<8x16xf32>
      %c0_13 = arith.constant 0 : index
      %c0_14 = arith.constant 0 : index
      %22 = vector.load %arg8[%c0_13, %c0_14] : memref<1x16xf32, #tpu.memory_space<vmem>>, vector<1x16xf32>
      %23 = vector.broadcast %22 : vector<1x16xf32> to vector<8x16xf32>
      %24 = arith.addf %21, %23 : vector<8x16xf32>
      %25 = math.tanh %24 : vector<8x16xf32>
      %c0_15 = arith.constant 0 : index
      %c0_16 = arith.constant 0 : index
      %26 = vector.load %arg9[%c0_15, %c0_16] : memref<8x16xf32, #tpu.memory_space<vmem>>, vector<8x16xf32>
      %cst_17 = arith.constant dense<0.000000e+00> : vector<8x8xf32>
      %27 = tpu.matmul %26, %25, %cst_17 {dimension_numbers = #tpu.dot_dimension_numbers<[1], [1], [0], [0], [0, 0, 1, 0], [], []>} : vector<8x16xf32>, vector<8x16xf32>, vector<8x8xf32> -> vector<8x8xf32>
      %28 = vector.extract_strided_slice %27 {offsets = [0, 0], sizes = [1, 8], strides = [1, 1]} : vector<8x8xf32> to vector<1x8xf32>
      %c0_18 = arith.constant 0 : index
      %c0_19 = arith.constant 0 : index
      %29 = memref.load %arg10[%c0_18, %c0_19] : memref<1x1xf32, #tpu.memory_space<smem>>
      %30 = vector.broadcast %29 : f32 to vector<1x8xf32>
      %31 = arith.addf %28, %30 : vector<1x8xf32>
      %c0_20 = arith.constant 0 : index
      %c0_21 = arith.constant 0 : index
      %32 = vector.load %arg11[%c0_20, %c0_21] : memref<1x8xf32, #tpu.memory_space<vmem>>, vector<1x8xf32>
      tpu.vector_store %arg11[%c0_20, %c0_21], %31 {strides = array<i32>} : memref<1x8xf32, #tpu.memory_space<vmem>>, vector<1x8xf32>,
    } else {
    }
    return
  }
  func.func @transform_0(%arg0: i32, %arg1: i32) -> (i32, i32) {
    %c1_i32 = arith.constant 1 : i32
    %0 = arith.subi %c1_i32, %arg0 : i32
    %1 = arith.muli %arg1, %0 : i32
    %c0_i32 = arith.constant 0 : i32
    %c0_i32_0 = arith.constant 0 : i32
    return %1, %c0_i32 : i32, i32
  }
  func.func @transform_1(%arg0: i32, %arg1: i32) -> (i32, i32) {
    %0 = arith.muli %arg1, %arg0 : i32
    %c0_i32 = arith.constant 0 : i32
    %c0_i32_0 = arith.constant 0 : i32
    return %0, %c0_i32 : i32, i32
  }
  func.func @transform_2(%arg0: i32, %arg1: i32) -> (i32, i32) {
    %c0_i32 = arith.constant 0 : i32
    %c0_i32_0 = arith.constant 0 : i32
    %c0_i32_1 = arith.constant 0 : i32
    return %c0_i32, %c0_i32_0 : i32, i32
  }
  func.func @transform_3(%arg0: i32, %arg1: i32) -> (i32, i32) {
    %c0_i32 = arith.constant 0 : i32
    %c0_i32_0 = arith.constant 0 : i32
    %c0_i32_1 = arith.constant 0 : i32
    return %c0_i32, %c0_i32_0 : i32, i32
  }
  func.func @transform_4(%arg0: i32, %arg1: i32) -> (i32, i32) {
    %c0_i32 = arith.constant 0 : i32
    %c0_i32_0 = arith.constant 0 : i32
    %c0_i32_1 = arith.constant 0 : i32
    return %c0_i32, %c0_i32_0 : i32, i32
  }
  func.func @transform_5(%arg0: i32, %arg1: i32) -> (i32, i32) {
    %c0_i32 = arith.constant 0 : i32
    %c0_i32_0 = arith.constant 0 : i32
    %c0_i32_1 = arith.constant 0 : i32
    return %c0_i32, %c0_i32_0 : i32, i32
  }
  func.func @transform_6(%arg0: i32, %arg1: i32) -> (i32, i32) {
    %c0_i32 = arith.constant 0 : i32
    %c0_i32_0 = arith.constant 0 : i32
    %c0_i32_1 = arith.constant 0 : i32
    return %c0_i32, %c0_i32_0 : i32, i32
  }
  func.func @transform_7(%arg0: i32, %arg1: i32) -> (i32, i32) {
    %c0_i32 = arith.constant 0 : i32
    %c0_i32_0 = arith.constant 0 : i32
    %c0_i32_1 = arith.constant 0 : i32
    return %c0_i32, %c0_i32_0 : i32, i32
  }
  func.func @transform_8(%arg0: i32, %arg1: i32) -> (i32, i32) {
    %c0_i32 = arith.constant 0 : i32
    %c0_i32_0 = arith.constant 0 : i32
    %c0_i32_1 = arith.constant 0 : i32
    return %c0_i32, %c0_i32_0 : i32, i32
  }
  func.func @transform_9(%arg0: i32, %arg1: i32) -> (i32, i32) {
    %0 = arith.muli %arg1, %arg0 : i32
    %c0_i32 = arith.constant 0 : i32
    %c0_i32_0 = arith.constant 0 : i32
    return %c0_i32, %0 : i32, i32
  }
}

</mosaic_0001>

<bundles_post_ra>
// kernel: critic_forward.1
= control target key start
LH: loop header
LB: loop body
LE: loop exit
PB: predicated region body
PF: predicated region fallthrough
CT: control target
= control target key end

     0   :  { %s1309_s0 = inlined_call_operand.hbm [shape: f32[8,12], index: 0, kind: input, shape index: {}]   ;;  %s1310_s1 = inlined_call_operand.vmem [shape: f32[8,4], index: 1, kind: input, shape index: {}]   ;;  %s1311_s2 = inlined_call_operand.vmem [shape: f32[12,16], index: 2, kind: input, shape index: {}]   ;;  %s1312_s3 = inlined_call_operand.vmem [shape: f32[1,16], index: 3, kind: input, shape index: {}]   ;;  %s1313_s4 = inlined_call_operand.vmem [shape: f32[16,16], index: 4, kind: input, shape index: {}]   ;;  %s1314_s5 = inlined_call_operand.vmem [shape: f32[4,16], index: 5, kind: input, shape index: {}]   ;;  %s1315_s6 = inlined_call_operand.vmem [shape: f32[1,16], index: 6, kind: input, shape index: {}]   ;;  %s1316_s7 = inlined_call_operand.vmem [shape: f32[8,16], index: 7, kind: input, shape index: {}]   ;;  %s1317_s8 = inlined_call_operand.<no memory space> [shape: f32[1,1], index: 8, kind: input, shape index: {}]   ;;  %s1318_s9 = inlined_call_operand.hbm [shape: f32[1,8], index: 9, kind: output, shape index: {}]  }
   0x1   :  { %14 = sst [smem:[#allocation7]] %s1317_s8 }
   0x2   :  { %15 = vsyncpa [#allocation9], 0 }
   0x3   :  { %17 = vsyncpa [#allocation9 + $0x1], 0 }
   0x4   :  { %18 = vsyncpa [#allocation10], 0 }
   0x5   :  { %20 = vsyncpa [#allocation10 + $0x1], 0  ;;  %s1185_s11 = smov 0   ;;  %s1187_s12 = smov 0  }
   0x6   :  { %s1189_s13 = smov 0  }
   0x7 LB: > { %s910_s8 = sadd.s32 4294967295, %s1121_s13   ;;  %s911_s14 = sadd.s32 4294967294, %s1121_s13   ;;  %s1121_s13 = sphi %s1189_s13, %s26_s13   ;;  %s1117_s12 = sphi %s1187_s12, %s1324_s12   ;;  %s1113_s11 = sphi %s1185_s11, %s1323_s11  }
   0x8   : > { %s38_s15 = sadd.s32 1, %s1117_s12  ;;  %p992_p2 = scmp.lt.s32.totalorder %s1121_s13, 2 }
   0x9   : > { %p40_p1 = scmp.ge.s32.totalorder %s38_s15, 2  ;;  %p993_p3 = scmp.eq.s32.totalorder %s1121_s13, 0 }
   0xa   : > { %s1123_s17 = smov [#allocation8]   ;;  %s1037_s21 = scalar_lea.hbm %s1309_s0, 128 }
   0xb   : > { %s1326_s15 = smov (%p40_p1, %s38_s15), 0  ;;  %p1208_p4 = pnand %p993_p3, %p992_p2 }
   0xc   : > { %s323_s18 = sshll.u32 %s1123_s17, 4  ;;  %p1038_p6 = scmp.ne.s32.totalorder %s1309_s0, %s1037_s21  ;;  %s324_s18 = int_to_ptr.vmem [resolvable:$true] %s323_s18 }
   0xd   : > { %p1039_p7 = pneg %p1208_p4  ;;  %p1044_p10 = scmp.lt.u32.totalorder %s1037_s21, %s1309_s0 }
   0xf   : > { %p1040_p8 = pnand %p1039_p7, %p1038_p6 }
  0x11   : > { %p1041_p9 = pneg %p1040_p8 }
  0x13   : > { %p1046_p11 = pnand %p1044_p10, %p1041_p9 }
  0x15   : > { %1049 = shalt.err (!%p1046_p11)
}
  0x16   : > { %s1050_s26 = scalar_lea.vmem %s324_s18, 128  ;;  %s1057_s27 = scalar_lea.vmem %s324_s18, 256 }
  0x17   : > { %p1051_p12 = scmp.ne.s32.totalorder %s324_s18, %s1050_s26  ;;  %p1058_p2 = scmp.lt.s32.totalorder %s324_s18, %s324_s18 }
  0x18   : > { %p1059_p3 = scmp.lt.s32.totalorder %s1057_s27, %s1050_s26 }
  0x19   : > { %p1053_p13 = pnand %p1051_p12, %p1039_p7 }
  0x1a   : > { %p1060_p0 = por %p1059_p3, %p1058_p2 }
  0x1b   : > { %p1054_p1 = pneg %p1053_p13 }
  0x1d   : > { %p1061_p5 = pnand %p1060_p0, %p1054_p1 }
  0x1f   : > { %1064 = shalt.err (!%p1061_p5)
}
  0x20   : > { %987 = dma.hbm_to_vmem [thread:$0]  (!%p1208_p4), %s1309_s0, 128, %s324_s18, [#allocation9]  }
  0x21   : > { %p337_p6 = scmp.lt.s32.totalorder %s1121_s13, 3  ;;  %p1320_p8 = scmp.ge.s32.totalorder %s1121_s13, 1 }
  0x23   : > { %p338_p9 = pnand %p1320_p8, %p337_p6 }
  0x24   : > { %p994_p7 = scmp.eq.s32.totalorder (!%p338_p9), %s910_s8, 0 }
  0x25   : > { %341 = sbr.rel (%p338_p9) target bundleno = 801 (0x321), region = 56 }
  0x2c   : > { %1104 = dma.done.wait (%p994_p7), [#allocation9], 128  }
  0x2d   : > { %1106 = vsyncadd (%p994_p7), [#allocation9], 4294967168  ;;  %p918_p0 = scmp.ne.s32.totalorder %s1113_s11, 0 }
  0x2e   : > { %v408_v0 = vld [vmem:[%s1311_s2] sm:$0xff] (!%p918_p0)  ;;  %v409_v1 = vld [vmem:[%s1311_s2 + $0x8] sm:$0xf] (!%p918_p0)  ;;  %vm421_vm0 = vcmask (!%p918_p0), 1043456   ;;  %v1124_v2 = vmov (!%p918_p0), 0.0|0.0   ;;  %vm1125_vm1 = vmmov (!%p918_p0), 1  }
  0x2f   : > { %399 = sbr.rel (%p918_p0) target bundleno = 324 (0x144), region = 64  ;;  %969 = vmatprep.subr.bf16.mxu0 (!%p918_p0), %v1124_v2  ;;  %v970_v3 = vpack.c.bf16 (!%p918_p0), %v409_v1, %v408_v0  ;;  %vm971_vm2 = vmpackc.low (!%p918_p0), %vm421_vm0, %vm1125_vm1  ;;  %vm404_vm3 = vcmask (!%p918_p0), 122880   ;;  %v1126_v4 = vmov (!%p918_p0), 0.0   ;;  %vm1127_vm4 = vmmov (!%p918_p0), 0   ;;  %v407_v5 = vld [vmem:[#allocation8] sm:$0xff] (!%p918_p0) }
  0x30   : > { %405 = vst.msk [vmem:[#allocation3] sm:$0x1] (!%p918_p0), %vm404_vm3, %v1126_v4  ;;  %406 = vst.msk [vmem:[#allocation4] sm:$0x1] (!%p918_p0), %vm404_vm3, %v1126_v4  ;;  %949 = vmatprep.mubr.msk.f32.mxu0 (!%p918_p0), %vm1127_vm4, %v1126_v4  ;;  %vm417_vm5 = vcmask (!%p918_p0), 97280   ;;  %vm497_vm6 = vcmask (!%p918_p0), 130048  }
  0x31   : > { %972 = vmatpush3.bf16.msk.msra.mxu0 (!%p918_p0), %vm971_vm2, %v970_v3  ;;  %v919_v6 = vld [vmem:[%s1312_s3] ss:$0 sm:$0xff] (!%p918_p0) }
  0x34   : > { %950 = vmatmul.mubr.msk.f32.vlgmr.msra.gmra.mrb[0].mxu0 (!%p918_p0), %vm417_vm5, %v407_v5 }
  0x37   : > { %v499_v23 = vld [vmem:[#allocation3] sm:$0x1]  ;;  %v510_v26 = vld [vmem:[#allocation4] sm:$0x1] }
 0x107   : > { %v491_v7 = vpop.f32.mrb[0].mxu0 }
 0x108   : > { %v492_v8 = vadd.f32 %v919_v6, %v491_v7  ;;  %v951_v9 = vpop.f32.mrb[1].mxu0 }
 0x10a   : > { %1031 = vtanh.f32 %v492_v8 }
 0x114   : > { %v1032_v10 = vpop.eup %1031 }
 0x115   : > { %498 = vst.msk [vmem:[#allocation2] sm:$0xff] %vm497_vm6, %v1032_v10  ;;  %v500_v11 = vsel %vm497_vm6, %v1032_v10, 0.0  ;;  %v511_v12 = vmul.f32 %v1032_v10, %v1032_v10 }
 0x116   : > { %v501_v13 = vrot.slane %v500_v11, 4 }
 0x117   : > { %v512_v14 = vsel %vm497_vm6, %v511_v12, 0.0 }
 0x118   : > { %v502_v15 = vadd.f32 %v501_v13, %v500_v11  ;;  %v513_v16 = vrot.slane %v512_v14, 4 }
 0x11a   : > { %v503_v17 = vrot.slane %v502_v15, 2  ;;  %v514_v18 = vadd.f32 %v513_v16, %v512_v14 }
 0x11c   : > { %v504_v19 = vadd.f32 %v503_v17, %v502_v15  ;;  %v515_v20 = vrot.slane %v514_v18, 2 }
 0x11e   : > { %v505_v21 = vrot.slane %v504_v19, 1  ;;  %v516_v22 = vadd.f32 %v515_v20, %v514_v18 }
 0x120   : > { %v506_v24 = vadd.f32 %v505_v21, %v504_v19  ;;  %v517_v25 = vrot.slane %v516_v22, 1 }
 0x122   : > { %v507_v27 = vadd.f32 %v506_v24, %v499_v23  ;;  %v518_v28 = vadd.f32 %v517_v25, %v516_v22 }
 0x124   : > { %509 = vst.msk [vmem:[#allocation3] sm:$0x1] %vm404_vm3, %v507_v27  ;;  %v519_v29 = vadd.f32 %v518_v28, %v510_v26 }
 0x126   : > { %520 = vst.msk [vmem:[#allocation4] sm:$0x1] %vm404_vm3, %v519_v29 }
 0x12b   : > { %v524_v30 = vld [vmem:[#allocation3] sm:$0x1] }
 0x12c   : > { %v525_v31 = vmul.f32 0.125, %v524_v30 }
 0x12d   : > { %v526_v32 = vld [vmem:[#allocation4] sm:$0x1] }
 0x12e   : > { %v527_v33 = vmul.f32 0.125, %v526_v32  ;;  %v528_v34 = vmul.f32 %v525_v31, %v525_v31  ;;  %v534_v38 = vsub.f32 0.0, %v525_v31 }
 0x130   : > { %v529_v35 = vsub.f32 %v527_v33, %v528_v34 }
 0x132   : > { %v530_v36 = vmax.f32 %v529_v35, 0.0 }
 0x134   : > { %v531_v37 = vadd.f32 1e-05, %v530_v36 }
 0x136   : > { %1033 = vrsqrt.f32 %v531_v37 }
 0x140   : > { %v1034_v39 = vpop.eup %1033 }
 0x141   : > { %533 = vst.msk [vmem:[#allocation5] sm:$0x1] %vm404_vm3, %v1034_v39  ;;  %v535_v40 = vmul.f32 %v1034_v39, %v534_v38 }
 0x143   : > { %536 = vst.msk [vmem:[#allocation6] sm:$0x1] %vm404_vm3, %v535_v40 }
 0x144 PF: > { %p922_p4 = scmp.ne.s32.totalorder %s1113_s11, 1 }
 0x145   : > { %v559_v41 = vld [vmem:[%s1313_s4] sm:$0xff] (!%p922_p4)  ;;  %v560_v42 = vld [vmem:[%s1313_s4 + $0x8] sm:$0xff] (!%p922_p4)  ;;  %v1128_v44 = vmov (!%p922_p4), 0.0|0.0   ;;  %v1129_v45 = vmov (!%p922_p4), 0.0   ;;  %vm567_vm7 = vcmask (!%p922_p4), 1043456   ;;  %vm563_vm8 = vcmask (!%p922_p4), 31744  }
 0x146   : > { %540 = sbr.rel (%p922_p4) target bundleno = 778 (0x30a), region = 76  ;;  %v562_v43 = vld [vmem:[%s1314_s5] sm:$0xf] (!%p922_p4)  ;;  %973 = vmatprep.subr.bf16.mxu1 (!%p922_p4), %v1128_v44  ;;  %952 = vmatprep.subr.mxu0 (!%p922_p4), %v1129_v45  ;;  %v974_v46 = vpack.c.bf16 (!%p922_p4), %v560_v42, %v559_v41  ;;  %vm1130_vm9 = vmmov (!%p922_p4), 0   ;;  %vm641_vm10 = vcmask (!%p922_p4), 130048   ;;  %s801_s10 = sld [smem:[#allocation7]] (!%p922_p4) }
 0x147   : > { %v561_v47 = vld [vmem:[%s1310_s1] sm:$0xff] (!%p922_p4)  ;;  %953 = vmatpush3.msk.msra.mxu0 (!%p922_p4), %vm567_vm7, %v562_v43  ;;  %954 = vmatprep.mubr.msk.f32.mxu0 (!%p922_p4), %vm1130_vm9, %v1129_v45  ;;  %vm804_vm11 = vcmask (!%p922_p4), 57344  }
 0x148   : > { %v542_v48 = vld [vmem:[#allocation2] sm:$0xff] (!%p922_p4)  ;;  %v923_v49 = vld [vmem:[#allocation5] ss:$0 sm:$0xff] (!%p922_p4)  ;;  %975 = vmatpush3.bf16.msra.mxu1 (!%p922_p4), %v974_v46  ;;  %955 = vmatmul.mubr.msk.f32.vlgmr.msra.gmra.mrb[0].mxu0 (!%p922_p4), %vm563_vm8, %v561_v47 }
 0x149   : > { %v550_v51 = vmul.f32 (!%p922_p4), %v923_v49, %v542_v48  ;;  %961 = vmatprep.mubr.msk.f32.mxu1 (!%p922_p4), %vm1130_vm9, %v1129_v45  ;;  %964 = vmatprep.subr.mxu0 (!%p922_p4), %v1129_v45  ;;  %v928_v56 = vld [vmem:[%s1315_s6] ss:$0 sm:$0xff] (!%p922_p4) }
 0x14a   : > { %v924_v50 = vld [vmem:[#allocation6] ss:$0 sm:$0xff] (!%p922_p4)  ;;  %966 = vmatprep.mubr.msk.f32.mxu0 (!%p922_p4), %vm1130_vm9, %v1129_v45  ;;  %v724_v61 = vld [vmem:[%s1316_s7] sm:$0xff] (!%p922_p4) }
 0x14b   : > { %v558_v52 = vadd.f32 (!%p922_p4), %v924_v50, %v550_v51 }
 0x14c   : > { %v802_v62 = vstv (!%p922_p4), %s801_s10 }
 0x14d   : > { %962 = vmatmul.mubr.msk.f32.vlgmr.msra.gmra.mrb[0].mxu1 %vm641_vm10, %v558_v52 }
 0x21b   : > { %v637_v53 = vpop.f32.mrb[0].mxu0 }
 0x21c   : > { %v956_v54 = vpop.f32.mrb[1].mxu0 }
 0x220   : > { %v711_v55 = vpop.f32.mrb[0].mxu1 }
 0x221   : > { %v712_v57 = vadd.f32 %v711_v55, %v637_v53  ;;  %v963_v58 = vpop.f32.mrb[1].mxu1 }
 0x223   : > { %v722_v59 = vadd.f32 %v928_v56, %v712_v57 }
 0x225   : > { %1035 = vtanh.f32 %v722_v59 }
 0x22f   : > { %v1036_v60 = vpop.eup %1035 }
 0x230   : > { %965 = vmatpush3.xpose.msk.msra.mxu0 %vm641_vm10, %v1036_v60 }
 0x233   : > { %967 = vmatmul.mubr.msk.f32.vlgmr.msra.gmra.mrb[2].mxu0 %vm641_vm10, %v724_v61 }
 0x306   : > { %v797_v63 = vpop.f32.mrb[2].mxu0 }
 0x307   : > { %v803_v0 = vadd.f32 %v802_v62, %v797_v63  ;;  %v968_v1 = vpop.f32.mrb[3].mxu0 }
 0x309   : > { %805 = vst.msk [vmem:[#allocation11] sm:$0x1] %vm804_vm11, %v803_v0 }
 0x30a PF: > { %p1274_p5 = scmp.eq.s32.totalorder %s910_s8, 1  ;;  %s1131_s17 = smov [#allocation11]  }
 0x30b   : > { %s820_s18 = sshll.u32 %s1131_s17, 4  ;;  %s821_s18 = int_to_ptr.vmem [resolvable:$true] %s820_s18 }
 0x30c   : > { %s1065_s19 = scalar_lea.vmem %s821_s18, 16  ;;  %s1071_s20 = scalar_lea.vmem %s821_s18, 32 }
 0x30d   : > { %p1066_p10 = scmp.ne.s32.totalorder %s821_s18, %s1065_s19  ;;  %p1072_p13 = scmp.lt.s32.totalorder %s821_s18, %s821_s18 }
 0x30e   : > { %p1073_p1 = scmp.lt.s32.totalorder %s1071_s20, %s1065_s19 }
 0x30f   : > { %p1067_p11 = pnand %p1066_p10, %p1274_p5 }
 0x310   : > { %p1074_p2 = por %p1073_p1, %p1072_p13 }
 0x311   : > { %p1068_p12 = pneg %p1067_p11 }
 0x313   : > { %p1075_p3 = pnand %p1074_p2, %p1068_p12 }
 0x315   : > { %1078 = shalt.err (!%p1075_p3)
}
 0x316   : > { %s1079_s22 = scalar_lea.hbm %s1318_s9, 16 }
 0x317   : > { %p1080_p6 = scmp.ne.s32.totalorder %s1318_s9, %s1079_s22  ;;  %p1085_p7 = scmp.lt.u32.totalorder %s1079_s22, %s1318_s9 }
 0x319   : > { %p1081_p8 = pnand %p1080_p6, %p1274_p5 }
 0x31b   : > { %p1082_p9 = pneg %p1081_p8 }
 0x31d   : > { %p1087_p0 = pnand %p1085_p7, %p1082_p9 }
 0x31f   : > { %1090 = shalt.err (!%p1087_p0)
}
 0x320   : > { %981 = dma.vmem_to_hbm [thread:$0]  (%p1274_p5), %s821_s18, 16, %s1318_s9, [#allocation10]  }
 0x321 PF: > { %p997_p4 = scmp.eq.s32.totalorder %s911_s14, 1  ;;  %p1322_p10 = scmp.ge.s32.totalorder %s1121_s13, 2 }
 0x323   : > { %p989_p11 = pnand %p997_p4, %p1322_p10 }
 0x325   : > { %1108 = dma.done.wait (!%p989_p11), [#allocation10], 16  }
 0x326   : > { %1110 = vsyncadd (!%p989_p11), [#allocation10], 4294967280  ;;  %s26_s13 = sadd.s32 1, %s1121_s13   ;;  %s1323_s11 = smov %s1117_s12 }
 0x327   : > { %p23_p12 = scmp.ge.s32.totalorder %s26_s13, 4   ;;  %s1324_s12 = smov %s1326_s15 }
 0x329   :  { %25 = sbr.rel (!%p23_p12) target bundleno = 7 (0x7), region = 122 }
 0x330   :  { %837 = vsyncpa [#allocation9], 1 }
 0x331   :  { %839 = vsyncpa [#allocation9 + $0x1], 1 }
 0x332   :  { %840 = vsyncpa [#allocation10], 1 }
 0x333   :  { %842 = vsyncpa [#allocation10 + $0x1], 1 }

</bundles_post_ra>
